<compile_context>
chip_gen: v6e
topology: v6e:2x2x1
jax: 0.10.0
libtpu: 0.0.40
codegen_flags: <defaults>
</compile_context>

<pallas_src>
import functools

import jax
import jax.numpy as jnp
from jax.experimental import pallas as pl
from jax.experimental.pallas import tpu as pltpu


def dot_attention_kernel(q_ref, ha_ref, hb_ref, o_ref, *, scale, bf16_compute):
    # q_ref: (TB, Dp)   ha_ref: (TB, La, Dp)   hb_ref: (TB, Lb, Dp)   o_ref: (TB, Dp)
    q = q_ref[...]
    ka = ha_ref[...]
    kb = hb_ref[...]

    if not (bf16_compute and q.dtype == jnp.bfloat16):
        # f32 everywhere (always for f32 inputs; forced on v5e which has no bf16 VALU).
        q = q.astype(jnp.float32)
        ka = ka.astype(jnp.float32)
        kb = kb.astype(jnp.float32)

    # Fold 1/sqrt(D) into q once (weakly-typed float keeps q's dtype).
    q = q * scale
    qb = q[:, None, :]                                              # (TB, 1, Dp)

    # Scores on the VPU: broadcast-multiply + lane reduction over D, accumulated
    # in f32.  keepdims keeps everything in the 3-D slab layout (no relayout).
    sa = jnp.sum(qb * ka, axis=-1, keepdims=True, dtype=jnp.float32)  # (TB, La, 1)
    sb = jnp.sum(qb * kb, axis=-1, keepdims=True, dtype=jnp.float32)  # (TB, Lb, 1)

    # Two-block softmax with a shared max and summed denominators.
    m = jnp.maximum(jnp.max(sa, axis=1, keepdims=True),
                    jnp.max(sb, axis=1, keepdims=True))             # (TB, 1, 1)
    pa = jnp.exp(sa - m)                                            # (TB, La, 1) f32
    pb = jnp.exp(sb - m)                                            # (TB, Lb, 1) f32
    denom = (jnp.sum(pa, axis=1, keepdims=True)
             + jnp.sum(pb, axis=1, keepdims=True))                  # (TB, 1, 1)
    inv = 1.0 / denom                                               # exact; tiny op

    # Encoding: sublane-weighted sum of keys/values over both history blocks.
    # Multiply in the key dtype (bf16 on v6e/v7x), accumulate in f32.
    enc = (jnp.sum(pa.astype(ka.dtype) * ka, axis=1, dtype=jnp.float32)
           + jnp.sum(pb.astype(kb.dtype) * kb, axis=1, dtype=jnp.float32))  # (TB, Dp)

    o_ref[...] = (enc * inv[:, 0, :]).astype(o_ref.dtype)


def _tpu_generation_config():
    """Per-generation (tag, VMEM tile budget, scoped-VMEM limit)."""
    kind = ""
    try:
        kind = jax.devices()[0].device_kind.lower()
    except Exception:
        pass
    if any(t in kind for t in ("v7", "tpu7", "7x")):
        # 64 MiB VMEM / TC, 2 TCs: modest tiles, keep >= 2 grid blocks (megacore).
        return "v7", 24 << 20, 48 << 20
    if "v6" in kind:
        # 128 MiB VMEM, 1 TC, HBM-bound kernel: go big to amortize per-step overhead.
        return "v6", 80 << 20, 100 << 20
    if "v5" in kind:
        # 128 MiB physical, 16 MiB scoped default -> raise the limit to match the budget.
        return "v5", 48 << 20, 64 << 20
    return "unknown", 24 << 20, 48 << 20


def _choose_block_b(B, La, Lb, Dp, itemsize, sub, budget, gen):
    """Batch-tile size: sublane-packing multiple, sized by the per-generation VMEM budget."""
    if B <= sub:
        return B  # single tile; full-array block dims are always legal
    # Per batch row: double-buffered pipelined in/out tiles (input dtype) plus
    # ~3 f32 words/element of in-kernel temps (conservative).
    bytes_per_row = (La + Lb + 2) * Dp * (2 * itemsize + 3 * 4)
    tb = min(B, max(sub, budget // max(bytes_per_row, 1)))
    tb = max(sub, (tb // sub) * sub)
    if gen == "v7":
        # Ensure n_blocks >= 2 so dimension_semantics=("parallel",) feeds both TCs.
        half = ((-(-B // 2)) + sub - 1) // sub * sub
        tb = min(tb, half)
    return tb


def text_encoder_forward(tweet, history_a, history_b):
    """tweet: (B, D); history_a: (B, La, D); history_b: (B, Lb, D). Returns (B, D)."""
    B, D = tweet.shape
    La = history_a.shape[1]
    Lb = history_b.shape[1]
    scale = 1.0 / (float(D) ** 0.5)      # uses the ORIGINAL D, before lane padding

    gen, budget, vmem_limit = _tpu_generation_config()

    # Lane-dense feature dim: pad D to a multiple of 128 (zeros change neither the
    # dot products nor the weighted sum; padded lanes are sliced off at the end).
    Dp = ((D + 127) // 128) * 128
    if Dp != D:
        pad_d = Dp - D
        tweet = jnp.pad(tweet, ((0, 0), (0, pad_d)))
        history_a = jnp.pad(history_a, ((0, 0), (0, 0), (0, pad_d)))
        history_b = jnp.pad(history_b, ((0, 0), (0, 0), (0, pad_d)))

    itemsize = tweet.dtype.itemsize
    sub = max(8, 32 // itemsize)          # sublane packing: 8 f32 / 16 bf16 / 32 int8
    block_b = _choose_block_b(B, La, Lb, Dp, itemsize, sub, budget, gen)

    # Pad batch to a multiple of the tile; padded (all-zero) rows give enc == 0
    # and are sliced off below.
    n_blocks = pl.cdiv(B, block_b)
    Bp = n_blocks * block_b
    if Bp != B:
        pad_b = Bp - B
        tweet = jnp.pad(tweet, ((0, pad_b), (0, 0)))
        history_a = jnp.pad(history_a, ((0, pad_b), (0, 0), (0, 0)))
        history_b = jnp.pad(history_b, ((0, pad_b), (0, 0), (0, 0)))

    bf16_compute = (tweet.dtype == jnp.bfloat16) and (gen != "v5")
    kernel = functools.partial(dot_attention_kernel,
                               scale=scale, bf16_compute=bf16_compute)

    out = pl.pallas_call(
        kernel,
        out_shape=jax.ShapeDtypeStruct((Bp, Dp), tweet.dtype),
        grid_spec=pltpu.PrefetchScalarGridSpec(
            num_scalar_prefetch=0,
            grid=(n_blocks,),
            in_specs=[
                pl.BlockSpec((block_b, Dp), lambda b: (b, 0)),
                pl.BlockSpec((block_b, La, Dp), lambda b: (b, 0, 0)),
                pl.BlockSpec((block_b, Lb, Dp), lambda b: (b, 0, 0)),
            ],
            out_specs=pl.BlockSpec((block_b, Dp), lambda b: (b, 0)),
        ),
        compiler_params=pltpu.CompilerParams(
            dimension_semantics=("parallel",),   # shards batch tiles across TCs on v7x
            vmem_limit_bytes=vmem_limit,         # consistent with _choose_block_b budget
        ),
    )(tweet, history_a, history_b)

    return out[:B, :D]


def _reference(tweet, history_a, history_b):
    B, D = tweet.shape
    q = tweet.reshape(B, 1, D).astype(jnp.float32)
    kv = jnp.concatenate([history_a, history_b], axis=1).astype(jnp.float32)
    scores = jnp.einsum("bqd,bkd->bqk", q, kv) / jnp.sqrt(jnp.float32(D))
    p = jax.nn.softmax(scores, axis=-1)
    enc = jnp.einsum("bqk,bkd->bqd", p, kv)
    return enc.reshape(B, D)


if __name__ == "__main__":
    key = jax.random.PRNGKey(0)

    # Case 1: tiny shape matching the module's forward (batch=2, history len=8, D=32).
    B, L, D = 2, 8, 32
    k1, k2, k3, k4 = jax.random.split(key, 4)
    tweet = jax.random.normal(k1, (B, D), dtype=jnp.float32)
    history_a = jax.random.normal(k2, (B, L, D), dtype=jnp.float32)
    history_b = jax.random.normal(k3, (B, L, D), dtype=jnp.float32)

    enc = jax.block_until_ready(text_encoder_forward(tweet, history_a, history_b))
    ref = _reference(tweet, history_a, history_b)
    assert enc.shape == (B, D)
    assert jnp.allclose(enc, ref, atol=1e-4, rtol=1e-4), "mismatch vs reference (case 1)"

    # Case 2: batch not a sublane multiple -> exercises batch padding / multi-block grid.
    B2 = 20
    k5, k6, k7 = jax.random.split(k4, 3)
    tweet2 = jax.random.normal(k5, (B2, D), dtype=jnp.float32)
    history_a2 = jax.random.normal(k6, (B2, L, D), dtype=jnp.float32)
    history_b2 = jax.random.normal(k7, (B2, L, D), dtype=jnp.float32)

    enc2 = jax.block_until_ready(text_encoder_forward(tweet2, history_a2, history_b2))
    ref2 = _reference(tweet2, history_a2, history_b2)
    assert enc2.shape == (B2, D)
    assert jnp.allclose(enc2, ref2, atol=1e-4, rtol=1e-4), "mismatch vs reference (case 2)"

    print("KERNEL_OK")
</pallas_src>

<mosaic_0001>
module attributes {stable_mosaic.version = 11 : i64} {
  func.func @dot_attention_kernel(%arg0: i32, %arg1: memref<2x128xf32, #tpu.memory_space<vmem>>, %arg2: memref<2x8x128xf32, #tpu.memory_space<vmem>>, %arg3: memref<2x8x128xf32, #tpu.memory_space<vmem>>, %arg4: memref<2x128xf32, #tpu.memory_space<vmem>>) attributes {dimension_semantics = [#tpu.dimension_semantics<parallel>], iteration_bounds = array<i64: 1>, scalar_prefetch = 0 : i64, scratch_operands = 0 : i64, tpu.core_type = #tpu.core_type<tc>, window_params = [{transform_indices = @transform_0, window_bounds = array<i64: 2, 128>}, {transform_indices = @transform_1, window_bounds = array<i64: 2, 8, 128>}, {transform_indices = @transform_2, window_bounds = array<i64: 2, 8, 128>}, {transform_indices = @transform_3, window_bounds = array<i64: 2, 128>}]} {
    %c0 = arith.constant 0 : index
    %c0_0 = arith.constant 0 : index
    %0 = vector.load %arg1[%c0, %c0_0] : memref<2x128xf32, #tpu.memory_space<vmem>>, vector<2x128xf32>
    %c0_1 = arith.constant 0 : index
    %c0_2 = arith.constant 0 : index
    %c0_3 = arith.constant 0 : index
    %1 = vector.load %arg2[%c0_1, %c0_2, %c0_3] : memref<2x8x128xf32, #tpu.memory_space<vmem>>, vector<2x8x128xf32>
    %c0_4 = arith.constant 0 : index
    %c0_5 = arith.constant 0 : index
    %c0_6 = arith.constant 0 : index
    %2 = vector.load %arg3[%c0_4, %c0_5, %c0_6] : memref<2x8x128xf32, #tpu.memory_space<vmem>>, vector<2x8x128xf32>
    %cst = arith.constant 0.176776692 : f32
    %3 = vector.broadcast %cst : f32 to vector<2x128xf32>
    %4 = arith.mulf %0, %3 : vector<2x128xf32>
    %5 = vector.shape_cast %4 : vector<2x128xf32> to vector<2x1x128xf32>
    %6 = vector.broadcast %5 : vector<2x1x128xf32> to vector<2x8x128xf32>
    %7 = arith.mulf %6, %1 : vector<2x8x128xf32>
    %cst_7 = arith.constant dense<0.000000e+00> : vector<2x8xf32>
    %8 = vector.multi_reduction <add>, %7, %cst_7 [2] : vector<2x8x128xf32> to vector<2x8xf32>
    %9 = vector.shape_cast %8 : vector<2x8xf32> to vector<2x8x1xf32>
    %10 = vector.broadcast %5 : vector<2x1x128xf32> to vector<2x8x128xf32>
    %11 = arith.mulf %10, %2 : vector<2x8x128xf32>
    %cst_8 = arith.constant dense<0.000000e+00> : vector<2x8xf32>
    %12 = vector.multi_reduction <add>, %11, %cst_8 [2] : vector<2x8x128xf32> to vector<2x8xf32>
    %13 = vector.shape_cast %12 : vector<2x8xf32> to vector<2x8x1xf32>
    %cst_9 = arith.constant dense<0xFF800000> : vector<2x1xf32>
    %14 = vector.multi_reduction <maximumf>, %9, %cst_9 [1] : vector<2x8x1xf32> to vector<2x1xf32>
    %15 = vector.shape_cast %14 : vector<2x1xf32> to vector<2x1x1xf32>
    %cst_10 = arith.constant dense<0xFF800000> : vector<2x1xf32>
    %16 = vector.multi_reduction <maximumf>, %13, %cst_10 [1] : vector<2x8x1xf32> to vector<2x1xf32>
    %17 = vector.shape_cast %16 : vector<2x1xf32> to vector<2x1x1xf32>
    %18 = arith.maximumf %15, %17 : vector<2x1x1xf32>
    %19 = vector.broadcast %18 : vector<2x1x1xf32> to vector<2x8x1xf32>
    %20 = arith.subf %9, %19 : vector<2x8x1xf32>
    %21 = math.exp %20 : vector<2x8x1xf32>
    %22 = vector.broadcast %18 : vector<2x1x1xf32> to vector<2x8x1xf32>
    %23 = arith.subf %13, %22 : vector<2x8x1xf32>
    %24 = math.exp %23 : vector<2x8x1xf32>
    %cst_11 = arith.constant dense<0.000000e+00> : vector<2x1xf32>
    %25 = vector.multi_reduction <add>, %21, %cst_11 [1] : vector<2x8x1xf32> to vector<2x1xf32>
    %26 = vector.shape_cast %25 : vector<2x1xf32> to vector<2x1x1xf32>
    %cst_12 = arith.constant dense<0.000000e+00> : vector<2x1xf32>
    %27 = vector.multi_reduction <add>, %24, %cst_12 [1] : vector<2x8x1xf32> to vector<2x1xf32>
    %28 = vector.shape_cast %27 : vector<2x1xf32> to vector<2x1x1xf32>
    %29 = arith.addf %26, %28 : vector<2x1x1xf32>
    %cst_13 = arith.constant 1.000000e+00 : f32
    %30 = vector.broadcast %cst_13 : f32 to vector<2x1x1xf32>
    %31 = arith.divf %30, %29 : vector<2x1x1xf32>
    %32 = vector.broadcast %21 : vector<2x8x1xf32> to vector<2x8x128xf32>
    %33 = arith.mulf %32, %1 : vector<2x8x128xf32>
    %cst_14 = arith.constant dense<0.000000e+00> : vector<2x128xf32>
    %34 = vector.multi_reduction <add>, %33, %cst_14 [1] : vector<2x8x128xf32> to vector<2x128xf32>
    %35 = vector.broadcast %24 : vector<2x8x1xf32> to vector<2x8x128xf32>
    %36 = arith.mulf %35, %2 : vector<2x8x128xf32>
    %cst_15 = arith.constant dense<0.000000e+00> : vector<2x128xf32>
    %37 = vector.multi_reduction <add>, %36, %cst_15 [1] : vector<2x8x128xf32> to vector<2x128xf32>
    %38 = arith.addf %34, %37 : vector<2x128xf32>
    %39 = vector.shape_cast %31 : vector<2x1x1xf32> to vector<2x1xf32>
    %40 = vector.broadcast %39 : vector<2x1xf32> to vector<2x128xf32>
    %41 = arith.mulf %38, %40 : vector<2x128xf32>
    %c0_16 = arith.constant 0 : index
    %c0_17 = arith.constant 0 : index
    %42 = vector.load %arg4[%c0_16, %c0_17] : memref<2x128xf32, #tpu.memory_space<vmem>>, vector<2x128xf32>
    tpu.vector_store %arg4[%c0_16, %c0_17], %41 {strides = array<i32>} : memref<2x128xf32, #tpu.memory_space<vmem>>, vector<2x128xf32>,
    return
  }
  func.func @transform_0(%arg0: i32) -> (i32, i32) {
    %c0_i32 = arith.constant 0 : i32
    %c0_i32_0 = arith.constant 0 : i32
    return %arg0, %c0_i32 : i32, i32
  }
  func.func @transform_1(%arg0: i32) -> (i32, i32, i32) {
    %c0_i32 = arith.constant 0 : i32
    %c0_i32_0 = arith.constant 0 : i32
    %c0_i32_1 = arith.constant 0 : i32
    return %arg0, %c0_i32, %c0_i32_0 : i32, i32, i32
  }
  func.func @transform_2(%arg0: i32) -> (i32, i32, i32) {
    %c0_i32 = arith.constant 0 : i32
    %c0_i32_0 = arith.constant 0 : i32
    %c0_i32_1 = arith.constant 0 : i32
    return %arg0, %c0_i32, %c0_i32_0 : i32, i32, i32
  }
  func.func @transform_3(%arg0: i32) -> (i32, i32) {
    %c0_i32 = arith.constant 0 : i32
    %c0_i32_0 = arith.constant 0 : i32
    return %arg0, %c0_i32 : i32, i32
  }
}

</mosaic_0001>

<bundles_post_ra>
// kernel: tpu_custom_call.1
= control target key start
LH: loop header
LB: loop body
LE: loop exit
PB: predicated region body
PF: predicated region fallthrough
CT: control target
= control target key end

     0   :  { %8 = vsyncpa [#allocation3], 0  ;;  %s383_s0 = inlined_call_operand.hbm [shape: f32[2,128], index: 0, kind: input, shape index: {}]   ;;  %s384_s1 = inlined_call_operand.hbm [shape: f32[2,8,128], index: 1, kind: input, shape index: {}]   ;;  %s385_s2 = inlined_call_operand.hbm [shape: f32[2,8,128], index: 2, kind: input, shape index: {}]   ;;  %s386_s3 = inlined_call_operand.hbm [shape: f32[2,128], index: 3, kind: output, shape index: {}]  }
   0x1   :  { %9 = vsyncpa [#allocation6], 0 }
   0x2   :  { %10 = vsyncpa [#allocation4], 0  ;;  %s332_s12 = smov [#allocation5]  }
   0x3   :  { %s26_s13 = sshll.u32 %s332_s12, 4  ;;  %s27_s13 = int_to_ptr.vmem [resolvable:$true] %s26_s13 }
   0x4   :  { %s254_s14 = scalar_lea.vmem %s27_s13, 256  ;;  %p259_p1 = scmp.lt.s32.totalorder %s27_s13, %s27_s13 }
   0x5   :  { %p255_p0 = scmp.ne.s32.totalorder %s27_s13, %s254_s14  ;;  %p260_p2 = scmp.lt.s32.totalorder %s254_s14, %s254_s14 }
   0x7   :  { %p261_p3 = por %p260_p2, %p259_p1 }
   0x9   :  { %p262_p4 = pnand %p261_p3, %p255_p0 }
   0xb   :  { %265 = shalt.err (!%p262_p4)
}
   0xc   :  { %s333_s15 = smov 128   ;;  %s334_s16 = smov 8  }
   0xd   :  { %32 = dma.hbm_to_vmem [thread:$0]  %s384_s1, 256, %s27_s13, [#allocation6], %s333_s15, %s333_s15, %s334_s16  }
   0xe   :  { %s335_s19 = smov [#allocation2]   ;;  %s336_s21 = smov [#allocation7]  }
   0xf   :  { %s17_s20 = sshll.u32 %s335_s19, 4  ;;  %s38_s22 = sshll.u32 %s336_s21, 4  ;;  %s18_s20 = int_to_ptr.vmem [resolvable:$true] %s17_s20  ;;  %s39_s22 = int_to_ptr.vmem [resolvable:$true] %s38_s22 }
  0x10   :  { %s274_s23 = scalar_lea.vmem %s18_s20, 32  ;;  %p279_p6 = scmp.lt.s32.totalorder %s18_s20, %s18_s20 }
  0x11   :  { %p275_p5 = scmp.ne.s32.totalorder %s18_s20, %s274_s23  ;;  %p280_p7 = scmp.lt.s32.totalorder %s274_s23, %s274_s23 }
  0x13   :  { %p281_p8 = por %p280_p7, %p279_p6 }
  0x15   :  { %p282_p9 = pnand %p281_p8, %p275_p5 }
  0x17   :  { %285 = shalt.err (!%p282_p9)
}
  0x18   :  { %20 = dma.hbm_to_vmem [thread:$0]  %s383_s0, 32, %s18_s20, [#allocation3]  }
  0x19   :  { %s294_s26 = scalar_lea.vmem %s39_s22, 256  ;;  %p299_p11 = scmp.lt.s32.totalorder %s39_s22, %s39_s22 }
  0x1a   :  { %p295_p10 = scmp.ne.s32.totalorder %s39_s22, %s294_s26  ;;  %p300_p12 = scmp.lt.s32.totalorder %s294_s26, %s294_s26 }
  0x1c   :  { %p301_p13 = por %p300_p12, %p299_p11 }
  0x1e   :  { %p302_p0 = pnand %p301_p13, %p295_p10 }
  0x20   :  { %305 = shalt.err (!%p302_p0)
}
  0x21   :  { %44 = dma.hbm_to_vmem [thread:$0]  %s385_s2, 256, %s39_s22, [#allocation6], %s333_s15, %s333_s15, %s334_s16  }
  0x22   :  { %326 = dma.done.wait [#allocation3], 32  }
  0x23   :  { %327 = vsyncadd [#allocation3], 4294967264 }
  0x24   :  { %328 = dma.done.wait [#allocation6], 512  }
  0x25   :  { %329 = vsyncadd [#allocation6], 4294966784  ;;  %v64_v0 = vlaneseq  ;;  %v337_v1 = vmov 1966171168   ;;  %v54_v6 = vld [vmem:[#allocation2] sm:$0x3] }
  0x26   :  { %v62_v2 = vunpack.c.l.s4 %v337_v1  ;;  %v59_v7 = vmul.f32 0.17677669, %v54_v6  ;;  %v368_v12 = vld [vmem:[#allocation7] sm:$0xff]  ;;  %v55_v13 = vld [vmem:[#allocation5] sm:$0xff]  ;;  %v370_v16 = vld [vmem:[#allocation7 + $0x8] sm:$0xff]  ;;  %s338_s0 = smov [#allocation8]  }
  0x27   :  { %v65_v3 = vshrl.u32 %v64_v0, 7  ;;  %v372_v17 = vld [vmem:[#allocation5 + $0x8] sm:$0xff]  ;;  %s217_s2 = sshll.u32 %s338_s0, 4  ;;  %vm207_vm0 = vcmask 1041409   ;;  %s218_s2 = int_to_ptr.vmem [resolvable:$true] %s217_s2 }
  0x28   :  { %v63_v4 = vunpack.c.0.s8 %v62_v2  ;;  %s306_s28 = scalar_lea.vmem %s218_s2, 32  ;;  %p311_p2 = scmp.lt.s32.totalorder %s218_s2, %s218_s2 }
  0x29   :  { %v85_v9 = vsub.s32 0, %v65_v3  ;;  %p307_p1 = scmp.ne.s32.totalorder %s218_s2, %s306_s28  ;;  %p312_p3 = scmp.lt.s32.totalorder %s306_s28, %s306_s28 }
  0x2a   :  { %v66_v5 = vsub.s32 %v63_v4, %v65_v3 }
  0x2b   :  { %p313_p4 = por %p312_p3, %p311_p2 }
  0x2c   :  { %v67_v8 = vrot.slane %v59_v7, %v66_v5 }
  0x2d   :  { %p314_p5 = pnand %p313_p4, %p307_p1 }
  0x2e   :  { %v75_v10 = vrot.slane %v67_v8, %v66_v5  ;;  %v68_v11 = vcombine.high %v67_v8, %v67_v8 }
  0x30   :  { %v86_v14 = vrot.slane %v75_v10, %v85_v9  ;;  %v82_v15 = vrot.slane %v68_v11, %v66_v5 }
  0x32   :  { %v99_v18 = vmul.f32 %v86_v14, %v368_v12  ;;  %v93_v19 = vmul.f32 %v86_v14, %v55_v13  ;;  %v90_v20 = vrot.slane %v82_v15, %v85_v9 }
  0x34   :  { %101 = vadd.xlane.f32.xlu1 %v99_v18  ;;  %95 = vadd.xlane.f32.xlu0 %v93_v19  ;;  %v100_v21 = vmul.f32 %v90_v20, %v370_v16  ;;  %v94_v22 = vmul.f32 %v90_v20, %v372_v17 }
  0x38   :  { %103 = vadd.xlane.f32.xlu1 %v100_v21  ;;  %97 = vadd.xlane.f32.xlu0 %v94_v22 }
  0xbd   :  { %v102_v23 = vpop.xlane.xlu1 %101  ;;  %v96_v24 = vpop.xlane.xlu0 %95 }
  0xbe   :  { %v117_v25 = vrot.slane %v102_v23, 4  ;;  %v105_v26 = vrot.slane %v96_v24, 4 }
  0xc0   :  { %v118_v27 = vmax.f32 %v102_v23, %v117_v25  ;;  %v106_v28 = vmax.f32 %v96_v24, %v105_v26 }
  0xc1   :  { %v104_v29 = vpop.xlane.xlu1 %103  ;;  %v98_v30 = vpop.xlane.xlu0 %97 }
  0xc2   :  { %v119_v31 = vrot.slane %v118_v27, 2  ;;  %v107_v32 = vrot.slane %v106_v28, 2  ;;  %v123_v33 = vrot.slane %v104_v29, 4  ;;  %v111_v34 = vrot.slane %v98_v30, 4 }
  0xc4   :  { %v120_v35 = vmax.f32 %v118_v27, %v119_v31  ;;  %v108_v36 = vmax.f32 %v106_v28, %v107_v32  ;;  %v124_v37 = vmax.f32 %v104_v29, %v123_v33  ;;  %v112_v38 = vmax.f32 %v98_v30, %v111_v34 }
  0xc6   :  { %v121_v39 = vrot.slane %v120_v35, 1  ;;  %v109_v40 = vrot.slane %v108_v36, 1  ;;  %v125_v41 = vrot.slane %v124_v37, 2  ;;  %v113_v42 = vrot.slane %v112_v38, 2 }
  0xc8   :  { %v122_v43 = vmax.f32 %v120_v35, %v121_v39  ;;  %v110_v44 = vmax.f32 %v108_v36, %v109_v40  ;;  %v126_v45 = vmax.f32 %v124_v37, %v125_v41  ;;  %v114_v46 = vmax.f32 %v112_v38, %v113_v42 }
  0xca   :  { %v129_v47 = vmax.f32 %v110_v44, %v122_v43  ;;  %v127_v48 = vrot.slane %v126_v45, 1  ;;  %v115_v49 = vrot.slane %v114_v46, 1 }
  0xcc   :  { %v131_v50 = vsub.f32 %v96_v24, %v129_v47  ;;  %v137_v51 = vsub.f32 %v102_v23, %v129_v47  ;;  %v128_v52 = vmax.f32 %v126_v45, %v127_v48  ;;  %v116_v53 = vmax.f32 %v114_v46, %v115_v49 }
  0xce   :  { %v133_v54 = vmul.f32 1.442695, %v131_v50  ;;  %v139_v55 = vmul.f32 1.442695, %v137_v51  ;;  %v130_v56 = vmax.f32 %v116_v53, %v128_v52 }
  0xd0   :  { %234 = vpow2.f32 %v133_v54  ;;  %v132_v57 = vsub.f32 %v98_v30, %v130_v56  ;;  %v138_v58 = vsub.f32 %v104_v29, %v130_v56 }
  0xd1   :  { %236 = vpow2.f32 %v139_v55 }
  0xd2   :  { %v135_v59 = vmul.f32 1.442695, %v132_v57  ;;  %v141_v60 = vmul.f32 1.442695, %v138_v58 }
  0xd4   :  { %238 = vpow2.f32 %v135_v59 }
  0xd5   :  { %240 = vpow2.f32 %v141_v60 }
  0xdd   :  { %v235_v61 = vpop.eup %234 }
  0xde   :  { %v237_v62 = vpop.eup %236  ;;  %v143_v63 = vrot.slane %v235_v61, 4  ;;  %v173_v2 = vmul.f32 %v235_v61, %v55_v13 }
  0xdf   :  { %v155_v0 = vrot.slane %v237_v62, 4  ;;  %v187_v3 = vmul.f32 %v237_v62, %v368_v12 }
  0xe0   :  { %v144_v1 = vadd.f32 %v235_v61, %v143_v63  ;;  %v175_v19 = vrot.slane %v173_v2, 4 }
  0xe1   :  { %v239_v4 = vpop.eup %238  ;;  %v156_v5 = vadd.f32 %v237_v62, %v155_v0  ;;  %v189_v20 = vrot.slane %v187_v3, 4 }
  0xe2   :  { %v241_v6 = vpop.eup %240  ;;  %v145_v7 = vrot.slane %v144_v1, 2  ;;  %v149_v8 = vrot.slane %v239_v4, 4  ;;  %v174_v9 = vmul.f32 %v239_v4, %v372_v17  ;;  %v176_v29 = vadd.f32 %v175_v19, %v173_v2 }
  0xe3   :  { %v157_v10 = vrot.slane %v156_v5, 2  ;;  %v161_v11 = vrot.slane %v241_v6, 4  ;;  %v188_v14 = vmul.f32 %v241_v6, %v370_v16  ;;  %v190_v17 = vadd.f32 %v189_v20, %v187_v3 }
  0xe4   :  { %v146_v15 = vadd.f32 %v145_v7, %v144_v1  ;;  %v150_v18 = vadd.f32 %v239_v4, %v149_v8  ;;  %v181_v13 = vrot.slane %v174_v9, 4  ;;  %v177_v37 = vrot.slane %v176_v29, 2 }
  0xe5   :  { %v158_v21 = vadd.f32 %v157_v10, %v156_v5  ;;  %v162_v22 = vadd.f32 %v241_v6, %v161_v11  ;;  %v195_v23 = vrot.slane %v188_v14, 4  ;;  %v191_v40 = vrot.slane %v190_v17, 2 }
  0xe6   :  { %v147_v12 = vrot.slane %v146_v15, 1  ;;  %v151_v24 = vrot.slane %v150_v18, 2  ;;  %v182_v32 = vadd.f32 %v181_v13, %v174_v9  ;;  %v178_v43 = vadd.f32 %v177_v37, %v176_v29 }
  0xe7   :  { %v159_v25 = vrot.slane %v158_v21, 1  ;;  %v163_v26 = vrot.slane %v162_v22, 2  ;;  %v196_v16 = vadd.f32 %v195_v23, %v188_v14  ;;  %v192_v45 = vadd.f32 %v191_v40, %v190_v17 }
  0xe8   :  { %v148_v27 = vadd.f32 %v147_v12, %v146_v15  ;;  %v152_v28 = vadd.f32 %v151_v24, %v150_v18  ;;  %v183_v39 = vrot.slane %v182_v32, 2  ;;  %v179_v47 = vrot.slane %v178_v43, 1 }
  0xe9   :  { %v160_v30 = vadd.f32 %v159_v25, %v158_v21  ;;  %v164_v31 = vadd.f32 %v163_v26, %v162_v22  ;;  %v197_v41 = vrot.slane %v196_v16, 2  ;;  %v193_v49 = vrot.slane %v192_v45, 1 }
  0xea   :  { %v153_v33 = vrot.slane %v152_v28, 1  ;;  %v184_v44 = vadd.f32 %v183_v39, %v182_v32  ;;  %v180_v51 = vadd.f32 %v179_v47, %v178_v43 }
  0xeb   :  { %v165_v34 = vrot.slane %v164_v31, 1  ;;  %v167_v35 = vadd.f32 %v160_v30, %v148_v27  ;;  %v198_v46 = vadd.f32 %v197_v41, %v196_v16  ;;  %v194_v53 = vadd.f32 %v193_v49, %v192_v45 }
  0xec   :  { %v154_v36 = vadd.f32 %v153_v33, %v152_v28  ;;  %v185_v48 = vrot.slane %v184_v44, 1 }
  0xed   :  { %v166_v38 = vadd.f32 %v165_v34, %v164_v31  ;;  %242 = vrcp.f32 %v167_v35  ;;  %v199_v50 = vrot.slane %v198_v46, 1  ;;  %v201_v56 = vadd.f32 %v194_v53, %v180_v51 }
  0xee   :  { %v186_v52 = vadd.f32 %v185_v48, %v184_v44 }
  0xef   :  { %v168_v42 = vadd.f32 %v166_v38, %v154_v36  ;;  %v200_v54 = vadd.f32 %v199_v50, %v198_v46 }
  0xf1   :  { %244 = vrcp.f32 %v168_v42  ;;  %v202_v57 = vadd.f32 %v200_v54, %v186_v52 }
  0xfa   :  { %v243_v55 = vpop.eup %242 }
  0xfb   :  { %v203_v59 = vmul.f32 %v243_v55, %v201_v56 }
  0xfe   :  { %v245_v58 = vpop.eup %244 }
  0xff   :  { %v204_v60 = vmul.f32 %v245_v58, %v202_v57 }
 0x101   :  { %v208_v61 = vsel %vm207_vm0, %v204_v60, %v203_v59 }
 0x102   :  { %210 = vst [vmem:[#allocation8] sm:$0x3] %v208_v61 }
 0x103   :  { %317 = shalt.err (!%p314_p5)
}
 0x104   :  { %220 = dma.vmem_to_hbm [thread:$0]  %s218_s2, 32, %s386_s3, [#allocation4]  }
 0x105   :  { %330 = dma.done.wait [#allocation4], 32  }
 0x106   :  { %331 = vsyncadd [#allocation4], 4294967264 }
 0x107   :  { %224 = vsyncpa [#allocation3], 1 }
 0x108   :  { %225 = vsyncpa [#allocation6], 1 }
 0x109   :  { %226 = vsyncpa [#allocation4], 1 }

</bundles_post_ra>
